<compile_context>
chip_gen: v7x
topology: tpu7x:2x2x1
jax: 0.10.0
libtpu: 0.0.40
codegen_flags: <defaults>
</compile_context>

<pallas_src>
import functools

import jax
import jax.numpy as jnp
from jax.experimental import pallas as pl
from jax.experimental.pallas import tpu as pltpu

EPS = 1e-5          # nn.InstanceNorm2d default eps
NEG_SLOPE = 0.01    # nn.LeakyReLU default negative_slope
LANE = 128


def _cnda_kernel(x_ref, w_ref, m_ref, seg_ref, segb_ref, gb_ref, o_ref, *,
                 W, KH, KW, HW_true):
    # x_ref   : (Cin, L)           input block, L = nb * HWp (HWp = pad128(H*W))
    # w_ref   : (Cout, KH*KW*Cin)  folded conv weights (tap-major, channel-minor K order)
    # m_ref   : (KH*KW, 1, L)      0/1 same-padding boundary masks per tap
    # seg_ref : (L, nb)            1 where lane l is a REAL pixel of sample b (stats)
    # segb_ref: (nb, L)            transpose of seg (broadcast per-sample values to lanes)
    # gb_ref  : (2, Cout, 1)       [gamma; beta] of the InstanceNorm affine (f32)
    # o_ref   : (Cout, L)
    nb = seg_ref.shape[1]
    L = x_ref.shape[1]
    ph, pw = (KH - 1) // 2, (KW - 1) // 2

    # --- Conv: build the im2col operand in VMEM (shifted + masked taps stacked along the
    # contraction axis), then ONE wide (Cout, K) x (K, L) MXU matmul. Spatial shifts are
    # lane rotations (XLU); out-of-bounds / cross-sample reads are zeroed by the masks.
    x = x_ref[...]
    taps = []
    t = 0
    for kh in range(KH):
        for kw in range(KW):
            dh, dw = kh - ph, kw - pw
            off = dh * W + dw
            if off == 0:
                taps.append(x)                            # center tap: mask is all-ones
            else:
                shifted = pltpu.roll(x, shift=(-off) % L, axis=1)
                taps.append(shifted * m_ref[t])           # (Cin, L) * (1, L)
            t += 1
    im2col = jnp.concatenate(taps, axis=0)                # (KH*KW*Cin, L), VMEM resident
    acc = jnp.dot(w_ref[...], im2col,
                  preferred_element_type=jnp.float32)     # (Cout, L) f32
    # Conv bias dropped: InstanceNorm mean subtraction cancels per-channel constants.

    # --- InstanceNorm2d: per-(sample, channel) stats over the TRUE H*W pixels.
    # One-pass sums / sums-of-squares as segment reductions on the MXU.
    seg = seg_ref[...]                                    # (L, nb) f32
    inv_n = 1.0 / float(HW_true)
    mean = jnp.dot(acc, seg, preferred_element_type=jnp.float32) * inv_n        # (Cout,nb)
    ex2 = jnp.dot(acc * acc, seg, preferred_element_type=jnp.float32) * inv_n   # (Cout,nb)
    var = jnp.maximum(ex2 - mean * mean, 0.0)
    rstd = jax.lax.rsqrt(var + EPS)
    scale = gb_ref[0] * rstd                              # (Cout, nb)
    shift = gb_ref[1] - mean * scale                      # (Cout, nb)

    if nb == 1:
        scale_l, shift_l = scale, shift                   # (Cout, 1) broadcasts on lanes
    else:
        segb = segb_ref[...]                              # (nb, L)
        scale_l = jnp.dot(scale, segb, preferred_element_type=jnp.float32)
        shift_l = jnp.dot(shift, segb, preferred_element_type=jnp.float32)

    y = acc * scale_l + shift_l
    # Dropout: p=0 / eval mode -> identity.
    # TODO(synk): training-mode dropout (random masking) not implemented; forward is eval.
    y = jnp.maximum(y, NEG_SLOPE * y)                     # LeakyReLU(0.01)
    o_ref[...] = y.astype(o_ref.dtype)


def _vmem_capacity_bytes():
    try:
        return int(pltpu.get_tpu_info().vmem_capacity_bytes)
    except Exception:
        return 64 * 1024 * 1024        # v7x lower bound; safe everywhere


def _vmem_estimate(nb, cin, cout, ktaps, hwp, in_bytes, out_bytes):
    """Rough per-grid-step VMEM bytes (input/output blocks are double-buffered)."""
    L = nb * hwp
    K = ktaps * cin
    b = 2 * cin * L * in_bytes          # input block
    b += 2 * cout * L * out_bytes       # output block
    b += ktaps * L * in_bytes           # boundary masks
    b += K * L * in_bytes               # im2col temporary
    b += 2 * L * nb * 4                 # seg / segb
    b += 5 * cout * L * 4               # acc, acc^2, scale/shift lanes, y (f32 temps)
    b += 2 * cin * L * in_bytes         # shifted-tap temporaries
    b += cout * K * in_bytes + 64 * cout
    return b


def _pick_batch_block(n, cin, cout, ktaps, hwp, in_bytes, out_bytes, budget,
                      max_block=8):
    """Largest divisor of n that fits the VMEM budget; prefer leaving >= 2 grid steps
    so a 2-TensorCore chip (v7x) keeps both cores busy via the 'parallel' batch axis."""
    divs = [d for d in range(1, n + 1) if n % d == 0 and d <= max_block]
    fits = [d for d in divs
            if _vmem_estimate(d, cin, cout, ktaps, hwp, in_bytes, out_bytes) <= budget]
    if not fits:
        fits = [1]
    pref = [d for d in fits if n // d >= 2]
    return max(pref) if pref else max(fits)


def cnda_forward(x, weight, bias, gamma, beta, *,
                 batch_block=None, compute_dtype=jnp.float32):
    """x: (N, Cin, H, W).  weight: (Cout, Cin, KH, KW) with odd KH/KW (same padding).
    `bias` is accepted for API parity but is mathematically cancelled by InstanceNorm.
    compute_dtype=jnp.bfloat16 is recommended on v6e/v7x (halves DMA; accumulation and
    normalization stay f32); keep f32 on v5e (no bf16 VPU)."""
    del bias  # InstanceNorm mean-subtraction cancels any per-channel constant exactly.
    N, Cin, H, W = x.shape
    Cout, _, KH, KW = weight.shape
    assert KH % 2 == 1 and KW % 2 == 1, "same-padding path assumes odd kernel sizes"
    KT = KH * KW
    HW = H * W
    HWp = ((HW + LANE - 1) // LANE) * LANE            # lane-dense per-sample length
    in_bytes = jnp.dtype(compute_dtype).itemsize
    out_bytes = jnp.dtype(x.dtype).itemsize

    vmem_cap = _vmem_capacity_bytes()
    if batch_block is None:
        nb = _pick_batch_block(N, Cin, Cout, KT, HWp, in_bytes, out_bytes,
                               budget=int(0.7 * vmem_cap))
    else:
        nb = batch_block
    assert N % nb == 0
    L = nb * HWp
    est = _vmem_estimate(nb, Cin, Cout, KT, HWp, in_bytes, out_bytes)
    vmem_limit = int(min(0.9 * vmem_cap, max(2 * est, 48 * 1024 * 1024)))

    # Input as (Cin, N*HWp): one wrapper-side transpose of x (1x read amplification,
    # no HBM im2col), spatial+batch on the lane axis, zero-padded per sample to HWp.
    x_t = jnp.transpose(x, (1, 0, 2, 3)).reshape(Cin, N, HW)
    if HWp != HW:
        x_t = jnp.pad(x_t, ((0, 0), (0, 0), (0, HWp - HW)))
    x_lanes = x_t.reshape(Cin, N * HWp).astype(compute_dtype)

    # Folded weights: (Cout, KH*KW*Cin), contraction index = (kh*KW + kw)*Cin + c.
    w_folded = jnp.transpose(weight, (0, 2, 3, 1)).reshape(Cout, KT * Cin)
    w_folded = w_folded.astype(compute_dtype)

    # Per-tap 0/1 same-padding boundary masks, padded to HWp and tiled over the nb
    # samples sharing a block's lane axis.
    ph, pw = (KH - 1) // 2, (KW - 1) // 2
    hh = jnp.arange(H)[:, None]
    ww = jnp.arange(W)[None, :]
    rows = []
    for kh in range(KH):
        for kw in range(KW):
            dh, dw = kh - ph, kw - pw
            m = ((hh + dh >= 0) & (hh + dh < H) & (ww + dw >= 0) & (ww + dw < W))
            rows.append(m.reshape(HW))
    masks = jnp.stack(rows, axis=0).astype(compute_dtype)          # (KT, HW)
    if HWp != HW:
        masks = jnp.pad(masks, ((0, 0), (0, HWp - HW)))
    masks = jnp.tile(masks, (1, nb)).reshape(KT, 1, L)

    # Segment matrices: seg picks the TRUE pixels of each sample (statistics);
    # its transpose broadcasts per-sample scale/shift back onto the lanes.
    lane = jnp.arange(L)
    seg = ((lane[:, None] // HWp == jnp.arange(nb)[None, :])
           & ((lane[:, None] % HWp) < HW)).astype(jnp.float32)     # (L, nb)
    segb = jnp.transpose(seg)                                      # (nb, L)

    gb = jnp.stack([gamma, beta], axis=0).astype(jnp.float32).reshape(2, Cout, 1)

    kernel = functools.partial(_cnda_kernel, W=W, KH=KH, KW=KW, HW_true=HW)
    out2d = pl.pallas_call(
        kernel,
        out_shape=jax.ShapeDtypeStruct((Cout, N * HWp), x.dtype),
        grid_spec=pltpu.PrefetchScalarGridSpec(
            num_scalar_prefetch=0,
            grid=(N // nb,),
            in_specs=[
                # TODO(synk): on v5e (lowest HBM BW, 128 MiB VMEM) consider
                # pipeline_mode=pl.Buffered(3) here when the block is small & HBM-bound.
                pl.BlockSpec((Cin, L), lambda i: (0, i)),           # input lanes
                pl.BlockSpec((Cout, KT * Cin), lambda i: (0, 0)),   # folded weights
                pl.BlockSpec((KT, 1, L), lambda i: (0, 0, 0)),      # boundary masks
                pl.BlockSpec((L, nb), lambda i: (0, 0)),            # segment (stats)
                pl.BlockSpec((nb, L), lambda i: (0, 0)),            # segment (broadcast)
                pl.BlockSpec((2, Cout, 1), lambda i: (0, 0, 0)),    # gamma/beta
            ],
            out_specs=pl.BlockSpec((Cout, L), lambda i: (0, i)),
        ),
        compiler_params=pltpu.CompilerParams(
            dimension_semantics=("parallel",),
            vmem_limit_bytes=vmem_limit),
    )(x_lanes, w_folded, masks, seg, segb, gb)
    # TODO(synk): for very large H*W on v7x (64 MiB VMEM), add an HW grid axis
    # ("arbitrary") with sum / sum-of-squares scratch accumulators (two-pass stats).

    out = out2d.reshape(Cout, N, HWp)[:, :, :HW].reshape(Cout, N, H, W)
    return jnp.transpose(out, (1, 0, 2, 3))


def _reference(x, weight, bias, gamma, beta):
    """Pure-JAX reference matching PyTorch Conv2d + InstanceNorm2d(affine) + LeakyReLU."""
    y = jax.lax.conv_general_dilated(
        x, weight, window_strides=(1, 1), padding="SAME",
        dimension_numbers=("NCHW", "OIHW", "NCHW"))
    y = y + bias[None, :, None, None]
    mean = jnp.mean(y, axis=(2, 3), keepdims=True)
    var = jnp.mean((y - mean) ** 2, axis=(2, 3), keepdims=True)
    y = (y - mean) / jnp.sqrt(var + EPS)
    y = y * gamma[None, :, None, None] + beta[None, :, None, None]
    return jnp.where(y >= 0, y, NEG_SLOPE * y)


if __name__ == "__main__":
    key = jax.random.PRNGKey(0)
    N, Cin, Cout, H, W = 2, 4, 8, 16, 16
    KH, KW = 3, 3

    kx, kwt, kb, kg, kbt = jax.random.split(key, 5)
    x = jax.random.normal(kx, (N, Cin, H, W), dtype=jnp.float32)
    weight = jax.random.normal(kwt, (Cout, Cin, KH, KW), dtype=jnp.float32) * 0.1
    bias = jax.random.normal(kb, (Cout,), dtype=jnp.float32) * 0.1
    gamma = 1.0 + 0.1 * jax.random.normal(kg, (Cout,), dtype=jnp.float32)
    beta = 0.1 * jax.random.normal(kbt, (Cout,), dtype=jnp.float32)

    ref = jax.block_until_ready(_reference(x, weight, bias, gamma, beta))

    # f32, auto batch-block (nb=1 -> 2 "parallel" grid steps).
    out = jax.block_until_ready(cnda_forward(x, weight, bias, gamma, beta))
    assert out.shape == (N, Cout, H, W)
    assert jnp.allclose(out, ref, atol=1e-4, rtol=1e-4), float(jnp.max(jnp.abs(out - ref)))

    # f32, forced nb=2 (exercises the in-kernel segment-sum / broadcast-back path).
    out2 = jax.block_until_ready(
        cnda_forward(x, weight, bias, gamma, beta, batch_block=2))
    assert jnp.allclose(out2, ref, atol=1e-4, rtol=1e-4), float(jnp.max(jnp.abs(out2 - ref)))

    # bf16 compute path (recommended on v6e/v7x): f32 accumulation, looser tolerance.
    out3 = jax.block_until_ready(
        cnda_forward(x, weight, bias, gamma, beta, compute_dtype=jnp.bfloat16))
    assert jnp.allclose(out3, ref, atol=1e-1, rtol=1e-1), float(jnp.max(jnp.abs(out3 - ref)))

    print("KERNEL_OK")
</pallas_src>

<mosaic_0001>
module attributes {stable_mosaic.version = 11 : i64} {
  func.func @_cnda_kernel(%arg0: i32, %arg1: memref<4x256xf32, #tpu.memory_space<vmem>>, %arg2: memref<8x36xf32, #tpu.memory_space<vmem>>, %arg3: memref<9x1x256xf32, #tpu.memory_space<vmem>>, %arg4: memref<256x1xf32, #tpu.memory_space<vmem>>, %arg5: memref<1x256xf32, #tpu.memory_space<vmem>>, %arg6: memref<2x8x1xf32, #tpu.memory_space<vmem>>, %arg7: memref<8x256xf32, #tpu.memory_space<vmem>>) attributes {dimension_semantics = [#tpu.dimension_semantics<parallel>], iteration_bounds = array<i64: 2>, scalar_prefetch = 0 : i64, scratch_operands = 0 : i64, tpu.core_type = #tpu.core_type<tc>, window_params = [{transform_indices = @transform_0, window_bounds = array<i64: 4, 256>}, {pipeline_mode = #tpu.pipeline_mode<synchronous>, transform_indices = @transform_1, window_bounds = array<i64: 8, 36>}, {pipeline_mode = #tpu.pipeline_mode<synchronous>, transform_indices = @transform_2, window_bounds = array<i64: 9, 1, 256>}, {pipeline_mode = #tpu.pipeline_mode<synchronous>, transform_indices = @transform_3, window_bounds = array<i64: 256, 1>}, {pipeline_mode = #tpu.pipeline_mode<synchronous>, transform_indices = @transform_4, window_bounds = array<i64: 1, 256>}, {pipeline_mode = #tpu.pipeline_mode<synchronous>, transform_indices = @transform_5, window_bounds = array<i64: 2, 8, 1>}, {transform_indices = @transform_6, window_bounds = array<i64: 8, 256>}]} {
    %c0 = arith.constant 0 : index
    %c0_0 = arith.constant 0 : index
    %0 = vector.load %arg1[%c0, %c0_0] : memref<4x256xf32, #tpu.memory_space<vmem>>, vector<4x256xf32>
    %c17_i32 = arith.constant 17 : i32
    %1 = tpu.dynamic_rotate %0 by %c17_i32 dim 1 : vector<4x256xf32>, i32 -> vector<4x256xf32>
    %c0_1 = arith.constant 0 : index
    %c0_2 = arith.constant 0 : index
    %c0_3 = arith.constant 0 : index
    %2 = vector.load %arg3[%c0_1, %c0_2, %c0_3] : memref<9x1x256xf32, #tpu.memory_space<vmem>>, vector<1x1x256xf32>
    %3 = vector.shape_cast %2 : vector<1x1x256xf32> to vector<1x256xf32>
    %4 = vector.broadcast %3 : vector<1x256xf32> to vector<4x256xf32>
    %5 = arith.mulf %1, %4 : vector<4x256xf32>
    %c16_i32 = arith.constant 16 : i32
    %6 = tpu.dynamic_rotate %0 by %c16_i32 dim 1 : vector<4x256xf32>, i32 -> vector<4x256xf32>
    %c1 = arith.constant 1 : index
    %c0_4 = arith.constant 0 : index
    %c0_5 = arith.constant 0 : index
    %7 = vector.load %arg3[%c1, %c0_4, %c0_5] : memref<9x1x256xf32, #tpu.memory_space<vmem>>, vector<1x1x256xf32>
    %8 = vector.shape_cast %7 : vector<1x1x256xf32> to vector<1x256xf32>
    %9 = vector.broadcast %8 : vector<1x256xf32> to vector<4x256xf32>
    %10 = arith.mulf %6, %9 : vector<4x256xf32>
    %c15_i32 = arith.constant 15 : i32
    %11 = tpu.dynamic_rotate %0 by %c15_i32 dim 1 : vector<4x256xf32>, i32 -> vector<4x256xf32>
    %c2 = arith.constant 2 : index
    %c0_6 = arith.constant 0 : index
    %c0_7 = arith.constant 0 : index
    %12 = vector.load %arg3[%c2, %c0_6, %c0_7] : memref<9x1x256xf32, #tpu.memory_space<vmem>>, vector<1x1x256xf32>
    %13 = vector.shape_cast %12 : vector<1x1x256xf32> to vector<1x256xf32>
    %14 = vector.broadcast %13 : vector<1x256xf32> to vector<4x256xf32>
    %15 = arith.mulf %11, %14 : vector<4x256xf32>
    %c1_i32 = arith.constant 1 : i32
    %16 = tpu.dynamic_rotate %0 by %c1_i32 dim 1 : vector<4x256xf32>, i32 -> vector<4x256xf32>
    %c3 = arith.constant 3 : index
    %c0_8 = arith.constant 0 : index
    %c0_9 = arith.constant 0 : index
    %17 = vector.load %arg3[%c3, %c0_8, %c0_9] : memref<9x1x256xf32, #tpu.memory_space<vmem>>, vector<1x1x256xf32>
    %18 = vector.shape_cast %17 : vector<1x1x256xf32> to vector<1x256xf32>
    %19 = vector.broadcast %18 : vector<1x256xf32> to vector<4x256xf32>
    %20 = arith.mulf %16, %19 : vector<4x256xf32>
    %c255_i32 = arith.constant 255 : i32
    %21 = tpu.dynamic_rotate %0 by %c255_i32 dim 1 : vector<4x256xf32>, i32 -> vector<4x256xf32>
    %c5 = arith.constant 5 : index
    %c0_10 = arith.constant 0 : index
    %c0_11 = arith.constant 0 : index
    %22 = vector.load %arg3[%c5, %c0_10, %c0_11] : memref<9x1x256xf32, #tpu.memory_space<vmem>>, vector<1x1x256xf32>
    %23 = vector.shape_cast %22 : vector<1x1x256xf32> to vector<1x256xf32>
    %24 = vector.broadcast %23 : vector<1x256xf32> to vector<4x256xf32>
    %25 = arith.mulf %21, %24 : vector<4x256xf32>
    %c241_i32 = arith.constant 241 : i32
    %26 = tpu.dynamic_rotate %0 by %c241_i32 dim 1 : vector<4x256xf32>, i32 -> vector<4x256xf32>
    %c6 = arith.constant 6 : index
    %c0_12 = arith.constant 0 : index
    %c0_13 = arith.constant 0 : index
    %27 = vector.load %arg3[%c6, %c0_12, %c0_13] : memref<9x1x256xf32, #tpu.memory_space<vmem>>, vector<1x1x256xf32>
    %28 = vector.shape_cast %27 : vector<1x1x256xf32> to vector<1x256xf32>
    %29 = vector.broadcast %28 : vector<1x256xf32> to vector<4x256xf32>
    %30 = arith.mulf %26, %29 : vector<4x256xf32>
    %c240_i32 = arith.constant 240 : i32
    %31 = tpu.dynamic_rotate %0 by %c240_i32 dim 1 : vector<4x256xf32>, i32 -> vector<4x256xf32>
    %c7 = arith.constant 7 : index
    %c0_14 = arith.constant 0 : index
    %c0_15 = arith.constant 0 : index
    %32 = vector.load %arg3[%c7, %c0_14, %c0_15] : memref<9x1x256xf32, #tpu.memory_space<vmem>>, vector<1x1x256xf32>
    %33 = vector.shape_cast %32 : vector<1x1x256xf32> to vector<1x256xf32>
    %34 = vector.broadcast %33 : vector<1x256xf32> to vector<4x256xf32>
    %35 = arith.mulf %31, %34 : vector<4x256xf32>
    %c239_i32 = arith.constant 239 : i32
    %36 = tpu.dynamic_rotate %0 by %c239_i32 dim 1 : vector<4x256xf32>, i32 -> vector<4x256xf32>
    %c8 = arith.constant 8 : index
    %c0_16 = arith.constant 0 : index
    %c0_17 = arith.constant 0 : index
    %37 = vector.load %arg3[%c8, %c0_16, %c0_17] : memref<9x1x256xf32, #tpu.memory_space<vmem>>, vector<1x1x256xf32>
    %38 = vector.shape_cast %37 : vector<1x1x256xf32> to vector<1x256xf32>
    %39 = vector.broadcast %38 : vector<1x256xf32> to vector<4x256xf32>
    %40 = arith.mulf %36, %39 : vector<4x256xf32>
    %41 = tpu.concatenate %5, %10, %15, %20, %0, %25, %30, %35, %40 in 0 : vector<4x256xf32>, vector<4x256xf32>, vector<4x256xf32>, vector<4x256xf32>, vector<4x256xf32>, vector<4x256xf32>, vector<4x256xf32>, vector<4x256xf32>, vector<4x256xf32> -> vector<36x256xf32>
    %c0_18 = arith.constant 0 : index
    %c0_19 = arith.constant 0 : index
    %42 = vector.load %arg2[%c0_18, %c0_19] : memref<8x36xf32, #tpu.memory_space<vmem>>, vector<8x36xf32>
    %cst = arith.constant dense<0.000000e+00> : vector<8x256xf32>
    %43 = tpu.matmul %42, %41, %cst {dimension_numbers = #tpu.dot_dimension_numbers<[1], [0], [0], [1], [0, 0, 1, 1], [], []>} : vector<8x36xf32>, vector<36x256xf32>, vector<8x256xf32> -> vector<8x256xf32>
    %c0_20 = arith.constant 0 : index
    %c0_21 = arith.constant 0 : index
    %44 = vector.load %arg4[%c0_20, %c0_21] : memref<256x1xf32, #tpu.memory_space<vmem>>, vector<256x1xf32>
    %cst_22 = arith.constant dense<0.000000e+00> : vector<8x1xf32>
    %45 = tpu.matmul %43, %44, %cst_22 {dimension_numbers = #tpu.dot_dimension_numbers<[1], [0], [0], [1], [0, 0, 1, 1], [], []>} : vector<8x256xf32>, vector<256x1xf32>, vector<8x1xf32> -> vector<8x1xf32>
    %cst_23 = arith.constant 3.906250e-03 : f32
    %46 = vector.broadcast %cst_23 : f32 to vector<8x1xf32>
    %47 = arith.mulf %45, %46 : vector<8x1xf32>
    %48 = arith.mulf %43, %43 : vector<8x256xf32>
    %cst_24 = arith.constant dense<0.000000e+00> : vector<8x1xf32>
    %49 = tpu.matmul %48, %44, %cst_24 {dimension_numbers = #tpu.dot_dimension_numbers<[1], [0], [0], [1], [0, 0, 1, 1], [], []>} : vector<8x256xf32>, vector<256x1xf32>, vector<8x1xf32> -> vector<8x1xf32>
    %cst_25 = arith.constant 3.906250e-03 : f32
    %50 = vector.broadcast %cst_25 : f32 to vector<8x1xf32>
    %51 = arith.mulf %49, %50 : vector<8x1xf32>
    %52 = arith.mulf %47, %47 : vector<8x1xf32>
    %53 = arith.subf %51, %52 : vector<8x1xf32>
    %cst_26 = arith.constant 0.000000e+00 : f32
    %54 = vector.broadcast %cst_26 : f32 to vector<8x1xf32>
    %55 = arith.maximumf %53, %54 : vector<8x1xf32>
    %cst_27 = arith.constant 9.99999974E-6 : f32
    %56 = vector.broadcast %cst_27 : f32 to vector<8x1xf32>
    %57 = arith.addf %55, %56 : vector<8x1xf32>
    %58 = math.rsqrt %57 : vector<8x1xf32>
    %c0_28 = arith.constant 0 : index
    %c0_29 = arith.constant 0 : index
    %c0_30 = arith.constant 0 : index
    %59 = vector.load %arg6[%c0_28, %c0_29, %c0_30] : memref<2x8x1xf32, #tpu.memory_space<vmem>>, vector<1x8x1xf32>
    %60 = vector.shape_cast %59 : vector<1x8x1xf32> to vector<8x1xf32>
    %61 = arith.mulf %60, %58 : vector<8x1xf32>
    %c1_31 = arith.constant 1 : index
    %c0_32 = arith.constant 0 : index
    %c0_33 = arith.constant 0 : index
    %62 = vector.load %arg6[%c1_31, %c0_32, %c0_33] : memref<2x8x1xf32, #tpu.memory_space<vmem>>, vector<1x8x1xf32>
    %63 = vector.shape_cast %62 : vector<1x8x1xf32> to vector<8x1xf32>
    %64 = arith.mulf %47, %61 : vector<8x1xf32>
    %65 = arith.subf %63, %64 : vector<8x1xf32>
    %66 = vector.broadcast %61 : vector<8x1xf32> to vector<8x256xf32>
    %67 = arith.mulf %43, %66 : vector<8x256xf32>
    %68 = vector.broadcast %65 : vector<8x1xf32> to vector<8x256xf32>
    %69 = arith.addf %67, %68 : vector<8x256xf32>
    %cst_34 = arith.constant 0.00999999977 : f32
    %70 = vector.broadcast %cst_34 : f32 to vector<8x256xf32>
    %71 = arith.mulf %70, %69 : vector<8x256xf32>
    %72 = arith.maximumf %69, %71 : vector<8x256xf32>
    %c0_35 = arith.constant 0 : index
    %c0_36 = arith.constant 0 : index
    %73 = vector.load %arg7[%c0_35, %c0_36] : memref<8x256xf32, #tpu.memory_space<vmem>>, vector<8x256xf32>
    tpu.vector_store %arg7[%c0_35, %c0_36], %72 {strides = array<i32>} : memref<8x256xf32, #tpu.memory_space<vmem>>, vector<8x256xf32>,
    return
  }
  func.func @transform_0(%arg0: i32) -> (i32, i32) {
    %c0_i32 = arith.constant 0 : i32
    %c0_i32_0 = arith.constant 0 : i32
    return %c0_i32, %arg0 : i32, i32
  }
  func.func @transform_1(%arg0: i32) -> (i32, i32) {
    %c0_i32 = arith.constant 0 : i32
    %c0_i32_0 = arith.constant 0 : i32
    %c0_i32_1 = arith.constant 0 : i32
    return %c0_i32, %c0_i32_0 : i32, i32
  }
  func.func @transform_2(%arg0: i32) -> (i32, i32, i32) {
    %c0_i32 = arith.constant 0 : i32
    %c0_i32_0 = arith.constant 0 : i32
    %c0_i32_1 = arith.constant 0 : i32
    %c0_i32_2 = arith.constant 0 : i32
    return %c0_i32, %c0_i32_0, %c0_i32_1 : i32, i32, i32
  }
  func.func @transform_3(%arg0: i32) -> (i32, i32) {
    %c0_i32 = arith.constant 0 : i32
    %c0_i32_0 = arith.constant 0 : i32
    %c0_i32_1 = arith.constant 0 : i32
    return %c0_i32, %c0_i32_0 : i32, i32
  }
  func.func @transform_4(%arg0: i32) -> (i32, i32) {
    %c0_i32 = arith.constant 0 : i32
    %c0_i32_0 = arith.constant 0 : i32
    %c0_i32_1 = arith.constant 0 : i32
    return %c0_i32, %c0_i32_0 : i32, i32
  }
  func.func @transform_5(%arg0: i32) -> (i32, i32, i32) {
    %c0_i32 = arith.constant 0 : i32
    %c0_i32_0 = arith.constant 0 : i32
    %c0_i32_1 = arith.constant 0 : i32
    %c0_i32_2 = arith.constant 0 : i32
    return %c0_i32, %c0_i32_0, %c0_i32_1 : i32, i32, i32
  }
  func.func @transform_6(%arg0: i32) -> (i32, i32) {
    %c0_i32 = arith.constant 0 : i32
    %c0_i32_0 = arith.constant 0 : i32
    return %c0_i32, %arg0 : i32, i32
  }
}

</mosaic_0001>

<bundles_post_ra>
// kernel: tpu_custom_call.1
= control target key start
LH: loop header
LB: loop body
LE: loop exit
PB: predicated region body
PF: predicated region fallthrough
CT: control target
= control target key end

     0   :  { %11 = vsyncpa [#allocation3], 0  ;;  %s1520_s0 = inlined_call_operand.vmem [shape: f32[4,512], index: 0, kind: input, shape index: {}]   ;;  %s1521_s1 = inlined_call_operand.vmem [shape: f32[8,36], index: 1, kind: input, shape index: {}]   ;;  %s1522_s2 = inlined_call_operand.vmem [shape: f32[9,1,256], index: 2, kind: input, shape index: {}]   ;;  %s1523_s3 = inlined_call_operand.vmem [shape: f32[256,1], index: 3, kind: input, shape index: {}]   ;;  %s1524_s4 = inlined_call_operand.vmem [shape: f32[1,256], index: 4, kind: input, shape index: {}]   ;;  %s1525_s5 = inlined_call_operand.vmem [shape: f32[2,8,1], index: 5, kind: input, shape index: {}]   ;;  %s1526_s6 = inlined_call_operand.hbm [shape: f32[8,512], index: 6, kind: output, shape index: {}]  }
   0x1   :  { %13 = vsyncpa [#allocation3 + $0x1], 0  ;;  %s1160_s21 = smov 0   ;;  %s1162_s22 = smov 0  }
   0x2   :  { %s1164_s23 = smov 0   ;;  %s1166_s24 = smov 0  }
   0x3 LB: > { %s1181_s4 = sadd.s32 4294967295, %s1112_s24   ;;  %s830_s25 = sadd.s32 4294967294, %s1112_s24   ;;  %s1112_s24 = sphi %s1166_s24, %s1532_s24   ;;  %s1108_s23 = sphi %s1164_s23, %s1531_s23   ;;  %s1104_s22 = sphi %s1162_s22, %s1530_s22   ;;  %s1100_s21 = sphi %s1160_s21, %s1529_s21  }
   0x4   : > { %s1185_s26 = sadd.s32 1, %s1112_s24   ;;  %s157_s27 = sadd.s32 1, %s1108_s23 }
   0x5   : > { %s154_s28 = ssub.s32 %s1112_s24, %s1185_s26  ;;  %p167_p0 = scmp.ne.s32.totalorder %s1108_s23, %s1104_s22 }
   0x6   : > { %p155_p1 = scmp.eq.s32.totalorder %s154_s28, 0  ;;  %p168_p2 = scmp.eq.s32.totalorder %s1181_s4, 1 }
   0x7   : > { %p173_p3 = scmp.ne.s32.totalorder %s1104_s22, %s1100_s21  ;;  %p174_p4 = scmp.eq.s32.totalorder %s830_s25, 1 }
   0x8   : > { %s1196_s29 = scalar_select %p155_p1, %s1108_s23, %s157_s27  }
   0x9   : > { %p1198_p5 = por %p168_p2, %p167_p0  ;;  %p1202_p6 = por %p174_p4, %p173_p3 }
   0xa   : > { %p833_p7 = scmp.ge.s32.totalorder %s1112_s24, 1  ;;  %p216_p8 = scmp.lt.s32.totalorder %s1112_s24, 3 }
   0xc   : > { %p217_p9 = pnand %p833_p7, %p216_p8 }
   0xd   : > { %s835_s8 = sshll.u32 (!%p217_p9), %s1181_s4, 1  ;;  %s1114_s13 = smov (!%p217_p9), 1   ;;  %v1120_v2 = vmov (!%p217_p9), 0.0   ;;  %v565_v3 = vld [vmem:[%s1523_s3 + $0x80] sm:$0xff] (!%p217_p9)  ;;  %v566_v4 = vld [vmem:[%s1523_s3 + $0x88] sm:$0xff] (!%p217_p9)  ;;  %v567_v8 = vld [vmem:[%s1523_s3 + $0x90] sm:$0xff] (!%p217_p9)  ;;  %v261_v48 = vlaneseq (!%p217_p9) }
   0xe   : > { %220 = sbr.rel (%p217_p9) target bundleno = 780 (0x30c), region = 44  ;;  %p247_p10 = scmp.lt.s32.totalorder (!%p217_p9), %s835_s8, 3  ;;  %542 = vmatprep.mubr.f32.mxu0 (!%p217_p9), %v1120_v2  ;;  %v549_v5 = vld [vmem:[%s1523_s3] sm:$0xff] (!%p217_p9)  ;;  %v1241_v6 = vpack.c.bf16 (!%p217_p9), %v566_v4, %v565_v3  ;;  %v550_v7 = vld [vmem:[%s1523_s3 + $0x8] sm:$0xff] (!%p217_p9)  ;;  %v568_v10 = vld [vmem:[%s1523_s3 + $0x98] sm:$0xff] (!%p217_p9)  ;;  %vm458_vm5 = vcmask (!%p217_p9), 1043456  }
   0xf   : > { %s1115_s14 = smov (!%p217_p9), 16   ;;  %s1116_s15 = smov (!%p217_p9), 17   ;;  %v1249_v9 = vpack.c.bf16 (!%p217_p9), %v550_v7, %v549_v5  ;;  %v551_v11 = vld [vmem:[%s1523_s3 + $0x10] sm:$0xff] (!%p217_p9)  ;;  %v552_v12 = vld [vmem:[%s1523_s3 + $0x18] sm:$0xff] (!%p217_p9)  ;;  %v1261_v13 = vpack.c.bf16 (!%p217_p9), %v568_v10, %v567_v8  ;;  %v569_v15 = vld [vmem:[%s1523_s3 + $0xa0] sm:$0xff] (!%p217_p9)  ;;  %v269_v49 = vshrl.u32 (!%p217_p9), %v261_v48, 7 }
  0x10   : > { %s1117_s16 = smov (!%p217_p9), 15   ;;  %s1118_s17 = smov (!%p217_p9), 127   ;;  %933 = vmatprep.subr.bf16.mxu1 (!%p217_p9), %v1241_v6  ;;  %v1264_v14 = vpack.c.bf16 (!%p217_p9), %v552_v12, %v551_v11  ;;  %v570_v16 = vld [vmem:[%s1523_s3 + $0xa8] sm:$0xff] (!%p217_p9)  ;;  %v553_v18 = vld [vmem:[%s1523_s3 + $0x20] sm:$0xff] (!%p217_p9)  ;;  %v571_v21 = vld [vmem:[%s1523_s3 + $0xb0] sm:$0xff] (!%p217_p9)  ;;  %v1369_v50 = vand.u32 (!%p217_p9), 127, %v261_v48 }
  0x11   : > { %s1119_s18 = smov (!%p217_p9), 112   ;;  %935 = vmatpush3.bf16.msra.mxu1 (!%p217_p9), %v1249_v9  ;;  %s1122_s20 = smov (!%p217_p9), 111   ;;  %v1275_v17 = vpack.c.bf16 (!%p217_p9), %v570_v16, %v569_v15  ;;  %v554_v19 = vld [vmem:[%s1523_s3 + $0x28] sm:$0xff] (!%p217_p9)  ;;  %v572_v22 = vld [vmem:[%s1523_s3 + $0xb8] sm:$0xff] (!%p217_p9)  ;;  %v555_v23 = vld [vmem:[%s1523_s3 + $0x30] sm:$0xff] (!%p217_p9)  ;;  %v1371_v53 = vsub.s32 (!%p217_p9), 0, %v269_v49 }
  0x12   : > { %937 = vmatprep.subr.bf16.mxu1 (!%p217_p9), %v1261_v13  ;;  %v1284_v20 = vpack.c.bf16 (!%p217_p9), %v554_v19, %v553_v18  ;;  %v1296_v24 = vpack.c.bf16 (!%p217_p9), %v572_v22, %v571_v21  ;;  %v556_v25 = vld [vmem:[%s1523_s3 + $0x38] sm:$0xff] (!%p217_p9)  ;;  %v573_v27 = vld [vmem:[%s1523_s3 + $0xc0] sm:$0xff] (!%p217_p9)  ;;  %v574_v28 = vld [vmem:[%s1523_s3 + $0xc8] sm:$0xff] (!%p217_p9)  ;;  %v1373_v54 = vsub.s32 (!%p217_p9), 1, %v269_v49  ;;  %vm328_vm0 = vcmp.lt.s32.totalorder (!%p217_p9), %v1369_v50, 1  ;;  %s243_s11 = sand.u32 (!%p217_p9), 1, %s1104_s22  }
  0x13   : > { %v1302_v26 = vpack.c.bf16 (!%p217_p9), %v556_v25, %v555_v23  ;;  %v557_v29 = vld [vmem:[%s1523_s3 + $0x40] sm:$0xff] (!%p217_p9)  ;;  %v1314_v30 = vpack.c.bf16 (!%p217_p9), %v574_v28, %v573_v27  ;;  %v558_v31 = vld [vmem:[%s1523_s3 + $0x48] sm:$0xff] (!%p217_p9)  ;;  %v575_v33 = vld [vmem:[%s1523_s3 + $0xd0] sm:$0xff] (!%p217_p9)  ;;  %vm284_vm1 = vcmp.lt.s32.totalorder (!%p217_p9), %v1369_v50, 16  ;;  %vm263_vm2 = vcmp.lt.s32.totalorder (!%p217_p9), %v1369_v50, 17  ;;  %s757_s19 = scalar_lea.sflag (!%p217_p9), [#allocation3], %s243_s11 }
  0x14   : > { %v1320_v32 = vpack.c.bf16 (!%p217_p9), %v558_v31, %v557_v29  ;;  %v576_v34 = vld [vmem:[%s1523_s3 + $0xd8] sm:$0xff] (!%p217_p9)  ;;  %v559_v35 = vld [vmem:[%s1523_s3 + $0x50] sm:$0xff] (!%p217_p9)  ;;  %v577_v39 = vld [vmem:[%s1523_s3 + $0xe0] sm:$0xff] (!%p217_p9)  ;;  %vm306_vm3 = vcmp.lt.s32.totalorder (!%p217_p9), %v1369_v50, 15  ;;  %vm350_vm4 = vcmp.lt.s32.totalorder (!%p217_p9), %v1369_v50, 127  ;;  %vm394_vm6 = vcmp.lt.s32.totalorder (!%p217_p9), %v1369_v50, 112 }
  0x15   : > { %s1534_s8 = smov (!%p247_p10, %s835_s8), 3  ;;  %939 = vmatpush3.bf16.msra.mxu1 %v1264_v14  ;;  %v1332_v36 = vpack.c.bf16 %v576_v34, %v575_v33  ;;  %v560_v37 = vld [vmem:[%s1523_s3 + $0x58] sm:$0xff]  ;;  %v578_v40 = vld [vmem:[%s1523_s3 + $0xe8] sm:$0xff]  ;;  %v561_v41 = vld [vmem:[%s1523_s3 + $0x60] sm:$0xff]  ;;  %vm372_vm7 = vcmp.lt.s32.totalorder %v1369_v50, 113  ;;  %vm416_vm8 = vcmp.lt.s32.totalorder %v1369_v50, 111 }
  0x16   : > { %s836_s9 = sshll.u32 %s1534_s8, 2  ;;  %941 = vmatprep.subr.bf16.mxu1 %v1275_v17  ;;  %v1338_v38 = vpack.c.bf16 %v560_v37, %v559_v35  ;;  %v1350_v42 = vpack.c.bf16 %v578_v40, %v577_v39  ;;  %v562_v43 = vld [vmem:[%s1523_s3 + $0x68] sm:$0xff]  ;;  %v579_v45 = vld [vmem:[%s1523_s3 + $0xf0] sm:$0xff]  ;;  %v580_v46 = vld [vmem:[%s1523_s3 + $0xf8] sm:$0xff]  ;;  %vm468_vm9 = vcmask 293888  }
  0x17   : > { %s250_s12 = scalar_lea.vmem %s1520_s0, %s836_s9  ;;  %s1121_s9 = smov 113   ;;  %v1356_v44 = vpack.c.bf16 %v562_v43, %v561_v41  ;;  %v1365_v47 = vpack.c.bf16 %v580_v46, %v579_v45  ;;  %v839_v55 = vld [vmem:[%s1522_s2 + $0x6] sm:$0x3]  ;;  %v837_v56 = vld [vmem:[%s1522_s2 + $0x2] sm:$0x3] }
  0x18   : > { %v1212_v0 = vld [vmem:[%s250_s12] sm:$0xff]  ;;  %v337_v59 = vrot.slane %v839_v55, %v1371_v53  ;;  %v341_v60 = vrot.slane %v839_v55, %v1373_v54  ;;  %v293_v2 = vrot.slane %v837_v56, %v1371_v53  ;;  %v297_v3 = vrot.slane %v837_v56, %v1373_v54  ;;  %v840_v33 = vld [vmem:[%s1522_s2 + $0xa] sm:$0x3]  ;;  %v842_v49 = vld [vmem:[%s1522_s2 + $0xe] sm:$0x3]  ;;  %s834_s12 = sshll.u32 %s243_s11, 4 }
  0x19   : > { %324 = vrot.lane.b32.xlu1 %v1212_v0, %s1114_s13  ;;  %280 = vrot.lane.b32.xlu0 %v1212_v0, %s1115_s14  ;;  %v1218_v1 = vcombine.high %v1212_v0, %v1212_v0  ;;  %v266_v61 = vld [vmem:[%s1522_s2] sm:$0x3]  ;;  %v838_v4 = vld [vmem:[%s1522_s2 + $0x4] sm:$0x3]  ;;  %v359_v46 = vrot.slane %v840_v33, %v1371_v53  ;;  %v363_v48 = vrot.slane %v840_v33, %v1373_v54 }
  0x1a   : > { %943 = vmatpush3.bf16.msra.mxu1 %v1284_v20  ;;  %v271_v5 = vrot.slane %v266_v61, %v1371_v53  ;;  %v275_v7 = vrot.slane %v266_v61, %v1373_v54  ;;  %v315_v21 = vrot.slane %v838_v4, %v1371_v53  ;;  %v319_v22 = vrot.slane %v838_v4, %v1373_v54 }
  0x1b   : > { %945 = vmatprep.subr.bf16.mxu1 %v1296_v24 }
  0x1d   : > { %257 = vrot.lane.b32.xlu0 %v1212_v0, %s1116_s15  ;;  %326 = vrot.lane.b32.xlu1 %v1218_v1, %s1114_s13  ;;  %s853_s13 = sshll.u32 %s1181_s4, 8 }
  0x1e   : > { %947 = vmatpush3.bf16.msra.mxu1 %v1302_v26 }
  0x1f   : > { %949 = vmatprep.subr.bf16.mxu1 %v1314_v30 }
  0x21   : > { %259 = vrot.lane.b32.xlu1 %v1218_v1, %s1116_s15  ;;  %282 = vrot.lane.b32.xlu0 %v1218_v1, %s1115_s14  ;;  %s245_s14 = scalar_lea.vmem [#allocation2], %s834_s12 }
  0x22   : > { %951 = vmatpush3.bf16.msra.mxu1 %v1320_v32  ;;  %s771_s15 = sshll.u32 %s245_s14, 4  ;;  %s1480_s15 = int_to_ptr.vmem [resolvable:$true] %s771_s15 }
  0x23   : > { %953 = vmatprep.subr.bf16.mxu1 %v1332_v36  ;;  %s1050_s4 = scalar_lea.vmem %s1480_s15, 256 }
  0x24   : > { %p1051_p11 = scmp.ne.s32.totalorder %s1480_s15, %s1050_s4 }
  0x25   : > { %304 = vrot.lane.b32.xlu1 %v1218_v1, %s1117_s16  ;;  %302 = vrot.lane.b32.xlu0 %v1212_v0, %s1117_s16 }
  0x26   : > { %955 = vmatpush3.bf16.msra.mxu1 %v1338_v38  ;;  %p1052_p12 = pnand %p1051_p11, %p1198_p5 }
  0x27   : > { %957 = vmatprep.subr.bf16.mxu1 %v1350_v42 }
  0x28   : > { %p1053_p13 = pneg %p1052_p12 }
  0x29   : > { %348 = vrot.lane.b32.xlu1 %v1218_v1, %s1118_s17  ;;  %346 = vrot.lane.b32.xlu0 %v1212_v0, %s1118_s17 }
  0x2a   : > { %959 = vmatpush3.bf16.msra.mxu1 %v1356_v44 }
  0x2b   : > { %961 = vmatprep.subr.bf16.mxu1 %v1365_v47 }
  0x2d   : > { %392 = vrot.lane.b32.xlu1 %v1218_v1, %s1119_s18  ;;  %390 = vrot.lane.b32.xlu0 %v1212_v0, %s1119_s18  ;;  %s1478_s18 = scalar_lea.hbm %s1526_s6, %s853_s13 }
  0x31   : > { %370 = vrot.lane.b32.xlu1 %v1218_v1, %s1121_s9  ;;  %368 = vrot.lane.b32.xlu0 %v1212_v0, %s1121_s9 }
  0x35   : > { %414 = vrot.lane.b32.xlu1 %v1218_v1, %s1122_s20  ;;  %412 = vrot.lane.b32.xlu0 %v1212_v0, %s1122_s20  ;;  %s1124_s20 = smov [#allocation2]  }
  0x36   : > { %s1054_s25 = sshll.u32 %s1124_s20, 4  ;;  %s1055_s25 = int_to_ptr.vmem [resolvable:$false] %s1054_s25 }
  0x37   : > { %s1056_s27 = scalar_lea.vmem %s1055_s25, 512  ;;  %p1057_p0 = scmp.lt.s32.totalorder %s1480_s15, %s1055_s25 }
  0x38   : > { %p1058_p1 = scmp.lt.s32.totalorder %s1056_s27, %s1050_s4 }
  0x3a   : > { %p1059_p2 = por %p1058_p1, %p1057_p0 }
  0x3c   : > { %p1060_p3 = pnand %p1059_p2, %p1053_p13 }
  0x8b   : > { %v325_v51 = vpop.permute.xlu1 %324  ;;  %v281_v52 = vpop.permute.xlu0 %280 }
  0x8f   : > { %v258_v57 = vpop.permute.xlu0 %257  ;;  %v327_v58 = vpop.permute.xlu1 %326 }
  0x90   : > { %v329_v62 = vsel %vm328_vm0, %v325_v51, %v327_v58  ;;  %v330_v63 = vsel %vm328_vm0, %v327_v58, %v325_v51 }
  0x91   : > { %v344_v11 = vmul.f32 %v337_v59, %v330_v63  ;;  %v345_v12 = vmul.f32 %v341_v60, %v329_v62  ;;  %v403_v63 = vrot.slane %v842_v49, %v1371_v53 }
  0x93   : > { %v260_v8 = vpop.permute.xlu1 %259  ;;  %v283_v10 = vpop.permute.xlu0 %282  ;;  %v442_v34 = vrot.slane %v344_v11, 4  ;;  %v443_v35 = vrot.slane %v345_v12, 4 }
  0x94   : > { %v285_v15 = vsel %vm284_vm1, %v281_v52, %v283_v10  ;;  %v286_v16 = vsel %vm284_vm1, %v283_v10, %v281_v52  ;;  %v264_v23 = vsel %vm263_vm2, %v258_v57, %v260_v8  ;;  %v265_v25 = vsel %vm263_vm2, %v260_v8, %v258_v57 }
  0x95   : > { %v300_v18 = vmul.f32 %v293_v2, %v286_v16  ;;  %v301_v19 = vmul.f32 %v297_v3, %v285_v15  ;;  %v278_v40 = vmul.f32 %v271_v5, %v265_v25  ;;  %v279_v41 = vmul.f32 %v275_v7, %v264_v23  ;;  %v841_v3 = vld [vmem:[%s1522_s2 + $0xc] sm:$0x3] }
  0x96   : > { %v407_v2 = vrot.slane %v842_v49, %v1373_v54  ;;  %v381_v16 = vrot.slane %v841_v3, %v1371_v53 }
  0x97   : > { %v436_v27 = vrot.slane %v300_v18, 4  ;;  %v437_v28 = vrot.slane %v301_v19, 4  ;;  %v305_v29 = vpop.permute.xlu1 %304  ;;  %v303_v31 = vpop.permute.xlu0 %302  ;;  %v385_v18 = vrot.slane %v841_v3, %v1373_v54  ;;  %v843_v19 = vld [vmem:[%s1522_s2 + $0x10] sm:$0x3] }
  0x98   : > { %v307_v37 = vsel %vm306_vm3, %v303_v31, %v305_v29  ;;  %v308_v39 = vsel %vm306_vm3, %v305_v29, %v303_v31  ;;  %v429_v29 = vrot.slane %v843_v19, %v1373_v54 }
  0x99   : > { %v322_v43 = vmul.f32 %v315_v21, %v308_v39  ;;  %v323_v45 = vmul.f32 %v319_v22, %v307_v37  ;;  %v460_v55 = vsel %vm458_vm5, %v279_v41, %v437_v28  ;;  %v459_v57 = vsel %vm458_vm5, %v278_v40, %v436_v27 }
  0x9a   : > { %v425_v37 = vrot.slane %v843_v19, %v1371_v53 }
  0x9b   : > { %v349_v51 = vpop.permute.xlu1 %348  ;;  %v347_v52 = vpop.permute.xlu0 %346  ;;  %v462_v56 = vsel %vm458_vm5, %v323_v45, %v443_v35  ;;  %v461_v58 = vsel %vm458_vm5, %v322_v43, %v442_v34 }
  0x9c   : > { %v351_v59 = vsel %vm350_vm4, %v347_v52, %v349_v51  ;;  %v352_v60 = vsel %vm350_vm4, %v349_v51, %v347_v52  ;;  %v924_v61 = vpack.c.bf16 %v462_v56, %v460_v55  ;;  %v926_v62 = vpack.c.bf16 %v461_v58, %v459_v57  ;;  %v730_v58 = vld [vmem:[%s1525_s5] sm:$0xff] }
  0x9d   : > { %v366_v4 = vmul.f32 %v359_v46, %v351_v59  ;;  %v367_v5 = vmul.f32 %v363_v48, %v352_v60 }
  0x9e   : > { %925 = vmatprep.subr.bf16.mxu0 %v924_v61  ;;  %v847_v61 = vld [vmem:[%s1525_s5 + $0x8] sm:$0xff] }
  0x9f   : > { %v393_v7 = vpop.permute.xlu1 %392  ;;  %927 = vmatpush1.bf16.msra.mxu0 %v926_v62  ;;  %v391_v8 = vpop.permute.xlu0 %390  ;;  %v448_v21 = vrot.slane %v366_v4, 4  ;;  %v449_v22 = vrot.slane %v367_v5, 4 }
  0xa0   : > { %v395_v10 = vsel %vm394_vm6, %v391_v8, %v393_v7  ;;  %v396_v11 = vsel %vm394_vm6, %v393_v7, %v391_v8 }
  0xa1   : > { %v410_v12 = vmul.f32 %v403_v63, %v395_v10  ;;  %v411_v15 = vmul.f32 %v407_v2, %v396_v11  ;;  %v464_v40 = vsel %vm458_vm5, %v1218_v1, %v449_v22  ;;  %v463_v45 = vsel %vm458_vm5, %v1212_v0, %v448_v21  ;;  %v467_v1 = vld [vmem:[%s1521_s1] sm:$0xff]  ;;  %v563_v0 = vld [vmem:[%s1523_s3 + $0x70] sm:$0xff] }
  0xa3   : > { %v371_v23 = vpop.permute.xlu1 %370  ;;  %v369_v25 = vpop.permute.xlu0 %368  ;;  %v454_v31 = vrot.slane %v410_v12, 4  ;;  %v455_v33 = vrot.slane %v411_v15, 4 }
  0xa4   : > { %v373_v27 = vsel %vm372_vm7, %v369_v25, %v371_v23  ;;  %v374_v28 = vsel %vm372_vm7, %v371_v23, %v369_v25 }
  0xa5   : > { %v388_v34 = vmul.f32 %v381_v16, %v373_v27  ;;  %v389_v35 = vmul.f32 %v385_v18, %v374_v28 }
  0xa7   : > { %v415_v39 = vpop.permute.xlu1 %414  ;;  %v466_v41 = vsel %vm458_vm5, %v389_v35, %v455_v33  ;;  %v413_v43 = vpop.permute.xlu0 %412  ;;  %v465_v50 = vsel %vm458_vm5, %v388_v34, %v454_v31 }
  0xa8   : > { %v928_v46 = vpack.c.bf16 %v466_v41, %v464_v40  ;;  %v417_v54 = vsel %vm416_vm8, %v413_v43, %v415_v39  ;;  %v418_v48 = vsel %vm416_vm8, %v415_v39, %v413_v43  ;;  %v930_v49 = vpack.c.bf16 %v465_v50, %v463_v45 }
  0xa9   : > { %v433_v51 = vmul.f32 %v429_v29, %v418_v48  ;;  %v432_v52 = vmul.f32 %v425_v37, %v417_v54 }
  0xaa   : > { %929 = vmatprep.subr.bf16.mxu0 %v928_v46 }
  0xab   : > { %931 = vmatpush1.bf16.msra.mxu0 %v930_v49 }
  0xac   : > { %844 = vmatprep.subr.msk.mxu0 %vm458_vm5, %v433_v51 }
  0xaf   : > { %845 = vmatpush1.msk.msra.mxu0 %vm458_vm5, %v432_v52 }
  0xb0   : > { %846 = vmatmul.mubr.msk.f32.vlgmr.msra.gmra.mrb[0].mxu0 %vm468_vm9, %v467_v1  ;;  %965 = vmatprep.subr.bf16.mxu0 %v1241_v6  ;;  %v564_v6 = vld [vmem:[%s1523_s3 + $0x78] sm:$0xff] }
  0xb1   : > { %967 = vmatpush3.bf16.msra.mxu0 %v1249_v9  ;;  %v962_v9 = vpack.c.bf16 %v564_v6, %v563_v0 }
  0xb2   : > { %969 = vmatprep.subr.bf16.mxu0 %v1261_v13 }
  0xb3   : > { %963 = vmatpush3.bf16.msra.mxu1 %v962_v9 }
  0xb5   : > { %971 = vmatpush3.bf16.msra.mxu0 %v1264_v14 }
  0xb6   : > { %973 = vmatprep.subr.bf16.mxu0 %v1275_v17 }
  0xb9   : > { %975 = vmatpush3.bf16.msra.mxu0 %v1284_v20 }
  0xba   : > { %977 = vmatprep.subr.bf16.mxu0 %v1296_v24  ;;  %v1123_v24 = vmov 0  }
  0xbb   : > { %1045 = vset.pattern.permute.xlu0 %v1123_v24  ;;  %1046 = vset.pattern.permute.xlu1 %v1123_v24 }
  0xbd   : > { %979 = vmatpush3.bf16.msra.mxu0 %v1302_v26 }
  0xbe   : > { %981 = vmatprep.subr.bf16.mxu0 %v1314_v30 }
  0xc1   : > { %983 = vmatpush3.bf16.msra.mxu0 %v1320_v32 }
  0xc2   : > { %985 = vmatprep.subr.bf16.mxu0 %v1332_v36 }
  0xc5   : > { %987 = vmatpush3.bf16.msra.mxu0 %v1338_v38 }
  0xc6   : > { %989 = vmatprep.subr.bf16.mxu0 %v1350_v42 }
  0xc9   : > { %991 = vmatpush3.bf16.msra.mxu0 %v1356_v44 }
  0xca   : > { %993 = vmatprep.subr.bf16.mxu0 %v1365_v47 }
  0xcd   : > { %995 = vmatpush3.bf16.msra.mxu0 %v962_v9 }
 0x183   : > { %v544_v13 = vpop.f32.mrb[0].mxu0 }
 0x184   : > { %v546_v14 = vpop.f32.mrb[1].mxu0  ;;  %v652_v20 = vmul.f32 %v544_v13, %v544_v13 }
 0x185   : > { %v653_v17 = vmul.f32 %v546_v14, %v546_v14  ;;  %645 = vmatprep.mubr.f32.mxu1 %v546_v14 }
 0x186   : > { %646 = vmatmul.mubr.f32.vlgmr.msra.gmra.mrb[0].mxu1 %v544_v13 }
 0x187   : > { %718 = vmatprep.mubr.f32.mxu0 %v653_v17 }
 0x188   : > { %719 = vmatmul.mubr.f32.vlgmr.msra.gmra.mrb[2].mxu0 %v652_v20 }
 0x259   : > { %v886_v26 = vpop.f32.mrb[0].mxu1 }
 0x25a   : > { %v887_v30 = vpop.f32.mrb[1].mxu1 }
 0x25b   : > { %v888_v32 = vadd.f32 %v887_v30, %v886_v26  ;;  %v921_v36 = vpop.f32.mrb[2].mxu0 }
 0x25c   : > { %v922_v38 = vpop.f32.mrb[3].mxu0 }
 0x25d   : > { %v651_v42 = vmul.f32 0.00390625, %v888_v32  ;;  %v923_v44 = vadd.f32 %v922_v38, %v921_v36 }
 0x25f   : > { %v725_v47 = vmul.f32 %v651_v42, %v651_v42  ;;  %v724_v53 = vmul.f32 0.00390625, %v923_v44 }
 0x261   : > { %v726_v55 = vsub.f32 %v724_v53, %v725_v47 }
 0x263   : > { %v727_v56 = vmax.f32 %v726_v55, 0.0 }
 0x265   : > { %v728_v57 = vadd.f32 1e-05, %v727_v56 }
 0x267   : > { %1048 = vrsqrt.f32 %v728_v57 }
 0x271   : > { %v1049_v59 = vpop.eup %1048 }
 0x272   : > { %v731_v60 = vmul.f32 %v1049_v59, %v730_v58 }
 0x274   : > { %738 = vperm.xlu0 %1045, %v731_v60   ;;  %v734_v62 = vmul.f32 %v731_v60, %v651_v42 }
 0x276   : > { %v735_v63 = vsub.f32 %v847_v61, %v734_v62 }
 0x278   : > { %745 = vperm.xlu1 %1046, %v735_v63  }
 0x2f3   : > { %v739_v2 = vpop.permute.xlu0 %738 }
 0x2f4   : > { %v741_v3 = vmul.f32 %v739_v2, %v544_v13  ;;  %v742_v4 = vmul.f32 %v739_v2, %v546_v14 }
 0x2f7   : > { %v746_v5 = vpop.permute.xlu1 %745 }
 0x2f8   : > { %v748_v7 = vadd.f32 %v746_v5, %v741_v3  ;;  %v749_v8 = vadd.f32 %v746_v5, %v742_v4 }
 0x2fa   : > { %v750_v10 = vmul.f32 0.01, %v748_v7  ;;  %v751_v11 = vmul.f32 0.01, %v749_v8 }
 0x2fc   : > { %v752_v12 = vmax.f32 %v748_v7, %v750_v10  ;;  %v753_v15 = vmax.f32 %v749_v8, %v751_v11 }
 0x2fe   : > { %754 = vst [vmem:[%s245_s14] sm:$0xff] %v752_v12  ;;  %755 = vst [vmem:[%s245_s14 + $0x8] sm:$0xff] %v753_v15 }
 0x2ff   : > { %1063 = shalt.err (!%p1060_p3)
}
 0x300   : > { %s1064_s28 = scalar_lea.hbm %s1478_s18, 256  ;;  %s1068_s10 = scalar_lea.hbm %s1526_s6, 512 }
 0x301   : > { %p1065_p4 = scmp.ne.s32.totalorder %s1478_s18, %s1064_s28  ;;  %p1069_p9 = scmp.lt.u32.totalorder %s1478_s18, %s1526_s6 }
 0x302   : > { %p1070_p10 = scmp.lt.u32.totalorder %s1068_s10, %s1064_s28  ;;  %p1072_p12 = scmp.lt.u32.totalorder %s1064_s28, %s1478_s18 }
 0x303   : > { %p1066_p7 = pnand %p1065_p4, %p1198_p5 }
 0x304   : > { %p1071_p11 = por %p1070_p10, %p1069_p9 }
 0x305   : > { %p1067_p8 = pneg %p1066_p7 }
 0x306   : > { %p1073_p13 = por %p1072_p12, %p1071_p11 }
 0x308   : > { %p1074_p0 = pnand %p1073_p13, %p1067_p8 }
 0x30a   : > { %1077 = shalt.err (!%p1074_p0)
}
 0x30b   : > { %996 = dma.vmem_to_hbm [thread:$0]  (%p1198_p5), %s1480_s15, 256, %s1478_s18, %s757_s19  }
 0x30c PF: > { %p1002_p1 = scmp.ge.s32.totalorder %s1112_s24, 2  ;;  %s783_s13 = sand.u32 1, %s1100_s21  }
 0x30d   : > { %s784_s14 = scalar_lea.sflag [#allocation3], %s783_s13 }
 0x30e   : > { %p999_p2 = pnand %p1002_p1, %p1202_p6 }
 0x310   : > { %1095 = dma.done.wait (!%p999_p2), %s784_s14, 256  }
 0x311   : > { %1097 = vsyncadd (!%p999_p2), %s784_s14, 4294967040  ;;  %p16_p3 = scmp.ge.s32.totalorder %s1185_s26, 4   ;;  %s1529_s21 = smov %s1104_s22 }
 0x312   : > { %s1530_s22 = smov %s1108_s23  ;;  %s1531_s23 = smov %s1196_s29 }
 0x313   : > { %s1532_s24 = smov %s1185_s26  ;;  %18 = sbr.rel (!%p16_p3) target bundleno = 3 (0x3), region = 87 }
 0x31a   :  { %789 = vsyncpa [#allocation3], 1 }
 0x31b   :  { %791 = vsyncpa [#allocation3 + $0x1], 1 }

</bundles_post_ra>
